<compile_context>
chip_gen: v5e
topology: v5e:2x2
jax: 0.10.0
libtpu: 0.0.40
codegen_flags: <defaults>
</compile_context>

<pallas_src>
import functools

import jax
import jax.numpy as jnp
from jax.experimental import pallas as pl
from jax.experimental.pallas import tpu as pltpu

HIDDEN = 64


def _round_up(n, m):
    return ((n + m - 1) // m) * m


def mlp_kernel(x_ref, w1_ref, b1_ref, w2_ref, b2_ref, w3_ref, b3_ref, out_ref,
               *, mm_dtype):
    # Cast the streamed rows to the matmul dtype inside VMEM (no extra HBM pass).
    x = x_ref[...].astype(mm_dtype)

    # --- layer1 + ReLU (dropout1 is identity in eval mode) -------------------
    h = jnp.dot(x, w1_ref[...], preferred_element_type=jnp.float32)
    h = jnp.maximum(h + b1_ref[...], 0.0)

    # --- layer2 + ReLU (dropout2 is identity in eval mode) -------------------
    h = jnp.dot(h.astype(mm_dtype), w2_ref[...], preferred_element_type=jnp.float32)
    h = jnp.maximum(h + b2_ref[...], 0.0)

    # --- layer3 + ReLU --------------------------------------------------------
    h = jnp.dot(h.astype(mm_dtype), w3_ref[...], preferred_element_type=jnp.float32)
    h = jnp.maximum(h + b3_ref[...], 0.0)

    # --- log_softmax along dim=1 (numerically stable, f32 throughout) ---------
    m = jnp.max(h, axis=1, keepdims=True)
    shifted = h - m
    lse = jnp.log(jnp.sum(jnp.exp(shifted), axis=1, keepdims=True))
    out_ref[...] = (shifted - lse).astype(out_ref.dtype)


def my_mlp_forward(x, params, *, tile_b=16384, use_bf16=True,
                   core_parallel=False):
    """x: (B, inputSize). Returns (B, outputSize) float32 log-probs."""
    w1, b1, w2, b2, w3, b3 = params
    B, d_in = x.shape
    d_hidden = w1.shape[1]
    d_out = w3.shape[1]

    # bf16 MXU operands; weights are tiny so the one-time cast is negligible.
    mm_dtype = jnp.bfloat16 if use_bf16 else jnp.dtype(x.dtype)
    if use_bf16:
        w1, w2, w3 = (w.astype(mm_dtype) for w in (w1, w2, w3))

    # ---- batch tile: as large as a ~40 MiB VMEM budget allows ---------------
    # (safe on v7x's 64 MiB physical VMEM; v5e/v6e have 128 MiB).
    x_item = jnp.dtype(x.dtype).itemsize
    mm_item = jnp.dtype(mm_dtype).itemsize
    per_row_bytes = (
        2 * d_in * x_item            # double-buffered x block
        + 2 * d_out * 4              # double-buffered out block (f32)
        + d_in * mm_item             # in-kernel matmul-dtype copy of x
        + 2 * d_hidden * 4           # live f32 hidden activations
        + d_hidden * mm_item         # matmul-dtype copy of hidden
        + 3 * d_out * 4              # h3 / shifted / exp temporaries
    )
    vmem_budget = 40 * 1024 * 1024
    tile_cap = max(8, (vmem_budget // per_row_bytes) // 16 * 16)
    tile_b = max(8, min(tile_b, tile_cap, _round_up(B, 8)) // 8 * 8)

    # Ragged last tile is handled by the pipeline (OOB writes are dropped),
    # so no jnp.pad of x and no output slice is needed.
    grid = (pl.cdiv(B, tile_b),)

    x_spec = pl.BlockSpec((tile_b, d_in), lambda i: (i, 0))
    out_spec = pl.BlockSpec((tile_b, d_out), lambda i: (i, 0))
    const = lambda shape: pl.BlockSpec(shape, lambda i: (0, 0))  # VMEM-resident

    weight_bytes = sum(a.size * a.dtype.itemsize
                       for a in (w1, b1, w2, b2, w3, b3))
    cost = pl.CostEstimate(
        flops=2 * B * (d_in * d_hidden + d_hidden * d_hidden + d_hidden * d_out),
        transcendentals=B * (d_out + 1),      # exp per logit + log per row
        bytes_accessed=B * d_in * x_item + B * d_out * 4 + weight_bytes,
    )

    # v7x: set core_parallel=True so the two TensorCores split the batch tiles.
    dim_sem = (pltpu.CORE_PARALLEL,) if core_parallel else ("parallel",)

    return pl.pallas_call(
        functools.partial(mlp_kernel, mm_dtype=mm_dtype),
        out_shape=jax.ShapeDtypeStruct((B, d_out), jnp.float32),
        grid=grid,
        in_specs=[
            x_spec,
            const((d_in, d_hidden)), const((1, d_hidden)),
            const((d_hidden, d_hidden)), const((1, d_hidden)),
            const((d_hidden, d_out)), const((1, d_out)),
        ],
        out_specs=out_spec,
        compiler_params=pltpu.CompilerParams(
            dimension_semantics=dim_sem,
            vmem_limit_bytes=48 * 1024 * 1024,   # > scoped default, < v7x physical
        ),
        cost_estimate=cost,
    )(x, w1, b1, w2, b2, w3, b3)


def my_mlp_reference(x, params):
    """Pure-JAX reference (f32) matching the PyTorch forward."""
    w1, b1, w2, b2, w3, b3 = params
    h = jnp.maximum(x @ w1 + b1, 0.0)
    h = jnp.maximum(h @ w2 + b2, 0.0)
    h = jnp.maximum(h @ w3 + b3, 0.0)
    return jax.nn.log_softmax(h, axis=1)


def init_params(key, input_size, output_size):
    """Deterministic init mirroring nn.Linear's U(-1/sqrt(fan_in), 1/sqrt(fan_in))."""
    ks = jax.random.split(key, 6)

    def linear(kw, kb, fan_in, fan_out):
        bound = 1.0 / jnp.sqrt(fan_in)
        w = jax.random.uniform(kw, (fan_in, fan_out), jnp.float32, -bound, bound)
        b = jax.random.uniform(kb, (1, fan_out), jnp.float32, -bound, bound)
        return w, b

    w1, b1 = linear(ks[0], ks[1], input_size, HIDDEN)
    w2, b2 = linear(ks[2], ks[3], HIDDEN, HIDDEN)
    w3, b3 = linear(ks[4], ks[5], HIDDEN, output_size)
    return (w1, b1, w2, b2, w3, b3)


if __name__ == "__main__":
    key = jax.random.PRNGKey(0)
    k_x, k_p, k_x2 = jax.random.split(key, 3)

    batch, input_size, output_size = 8, 32, 16
    x = jax.random.normal(k_x, (batch, input_size), jnp.float32)
    params = init_params(k_p, input_size, output_size)
    ref = my_mlp_reference(x, params)

    # Production config: bf16 MXU operands, f32 elementwise + log_softmax.
    out = my_mlp_forward(x, params, use_bf16=True)
    jax.block_until_ready(out)
    assert out.shape == (batch, output_size)
    # log_softmax rows must (log-)sum to ~0 and stay close to the f32 reference.
    row_lse = jax.scipy.special.logsumexp(out, axis=1)
    assert bool(jnp.all(jnp.abs(row_lse) < 1e-3))
    assert bool(jnp.allclose(out, ref, atol=1e-1, rtol=1e-1))

    # Exact-semantics check (f32 kernel path) against the pure-JAX reference.
    out_f32 = my_mlp_forward(x, params, use_bf16=False)
    jax.block_until_ready(out_f32)
    assert bool(jnp.allclose(out_f32, ref, atol=5e-3, rtol=5e-3))

    # Ragged batch: exercised via the pipeline's partial last block
    # (no wrapper-side padding or output slicing).
    batch2 = 37
    x2 = jax.random.normal(k_x2, (batch2, input_size), jnp.float32)
    out2 = my_mlp_forward(x2, params, use_bf16=False)
    jax.block_until_ready(out2)
    assert out2.shape == (batch2, output_size)
    assert bool(jnp.allclose(out2, my_mlp_reference(x2, params),
                             atol=5e-3, rtol=5e-3))

    print("KERNEL_OK")
</pallas_src>

<mosaic_0001>
module attributes {stable_mosaic.version = 11 : i64} {
  func.func @mlp_kernel(%arg0: i32, %arg1: memref<8x32xf32, #tpu.memory_space<vmem>>, %arg2: memref<32x64xbf16, #tpu.memory_space<vmem>>, %arg3: memref<1x64xf32, #tpu.memory_space<vmem>>, %arg4: memref<64x64xbf16, #tpu.memory_space<vmem>>, %arg5: memref<1x64xf32, #tpu.memory_space<vmem>>, %arg6: memref<64x16xbf16, #tpu.memory_space<vmem>>, %arg7: memref<1x16xf32, #tpu.memory_space<vmem>>, %arg8: memref<8x16xf32, #tpu.memory_space<vmem>>) attributes {dimension_semantics = [#tpu.dimension_semantics<parallel>], iteration_bounds = array<i64: 1>, scalar_prefetch = 0 : i64, scratch_operands = 0 : i64, tpu.core_type = #tpu.core_type<tc>, window_params = [{transform_indices = @transform_0, window_bounds = array<i64: 8, 32>}, {pipeline_mode = #tpu.pipeline_mode<synchronous>, transform_indices = @transform_1, window_bounds = array<i64: 32, 64>}, {pipeline_mode = #tpu.pipeline_mode<synchronous>, transform_indices = @transform_2, window_bounds = array<i64: 1, 64>}, {pipeline_mode = #tpu.pipeline_mode<synchronous>, transform_indices = @transform_3, window_bounds = array<i64: 64, 64>}, {pipeline_mode = #tpu.pipeline_mode<synchronous>, transform_indices = @transform_4, window_bounds = array<i64: 1, 64>}, {pipeline_mode = #tpu.pipeline_mode<synchronous>, transform_indices = @transform_5, window_bounds = array<i64: 64, 16>}, {pipeline_mode = #tpu.pipeline_mode<synchronous>, transform_indices = @transform_6, window_bounds = array<i64: 1, 16>}, {transform_indices = @transform_7, window_bounds = array<i64: 8, 16>}]} {
    %c0 = arith.constant 0 : index
    %c0_0 = arith.constant 0 : index
    %0 = vector.load %arg1[%c0, %c0_0] : memref<8x32xf32, #tpu.memory_space<vmem>>, vector<8x32xf32>
    %1 = arith.truncf %0 : vector<8x32xf32> to vector<8x32xbf16>
    %c0_1 = arith.constant 0 : index
    %c0_2 = arith.constant 0 : index
    %2 = vector.load %arg2[%c0_1, %c0_2] : memref<32x64xbf16, #tpu.memory_space<vmem>>, vector<32x64xbf16>
    %cst = arith.constant dense<0.000000e+00> : vector<8x64xf32>
    %3 = tpu.matmul %1, %2, %cst {dimension_numbers = #tpu.dot_dimension_numbers<[1], [0], [0], [1], [0, 0, 1, 1], [], []>} : vector<8x32xbf16>, vector<32x64xbf16>, vector<8x64xf32> -> vector<8x64xf32>
    %c0_3 = arith.constant 0 : index
    %c0_4 = arith.constant 0 : index
    %4 = vector.load %arg3[%c0_3, %c0_4] : memref<1x64xf32, #tpu.memory_space<vmem>>, vector<1x64xf32>
    %5 = vector.broadcast %4 : vector<1x64xf32> to vector<8x64xf32>
    %6 = arith.addf %3, %5 : vector<8x64xf32>
    %cst_5 = arith.constant 0.000000e+00 : f32
    %7 = vector.broadcast %cst_5 : f32 to vector<8x64xf32>
    %8 = arith.maximumf %6, %7 : vector<8x64xf32>
    %9 = arith.truncf %8 : vector<8x64xf32> to vector<8x64xbf16>
    %c0_6 = arith.constant 0 : index
    %c0_7 = arith.constant 0 : index
    %10 = vector.load %arg4[%c0_6, %c0_7] : memref<64x64xbf16, #tpu.memory_space<vmem>>, vector<64x64xbf16>
    %cst_8 = arith.constant dense<0.000000e+00> : vector<8x64xf32>
    %11 = tpu.matmul %9, %10, %cst_8 {dimension_numbers = #tpu.dot_dimension_numbers<[1], [0], [0], [1], [0, 0, 1, 1], [], []>} : vector<8x64xbf16>, vector<64x64xbf16>, vector<8x64xf32> -> vector<8x64xf32>
    %c0_9 = arith.constant 0 : index
    %c0_10 = arith.constant 0 : index
    %12 = vector.load %arg5[%c0_9, %c0_10] : memref<1x64xf32, #tpu.memory_space<vmem>>, vector<1x64xf32>
    %13 = vector.broadcast %12 : vector<1x64xf32> to vector<8x64xf32>
    %14 = arith.addf %11, %13 : vector<8x64xf32>
    %cst_11 = arith.constant 0.000000e+00 : f32
    %15 = vector.broadcast %cst_11 : f32 to vector<8x64xf32>
    %16 = arith.maximumf %14, %15 : vector<8x64xf32>
    %17 = arith.truncf %16 : vector<8x64xf32> to vector<8x64xbf16>
    %c0_12 = arith.constant 0 : index
    %c0_13 = arith.constant 0 : index
    %18 = vector.load %arg6[%c0_12, %c0_13] : memref<64x16xbf16, #tpu.memory_space<vmem>>, vector<64x16xbf16>
    %cst_14 = arith.constant dense<0.000000e+00> : vector<8x16xf32>
    %19 = tpu.matmul %17, %18, %cst_14 {dimension_numbers = #tpu.dot_dimension_numbers<[1], [0], [0], [1], [0, 0, 1, 1], [], []>} : vector<8x64xbf16>, vector<64x16xbf16>, vector<8x16xf32> -> vector<8x16xf32>
    %c0_15 = arith.constant 0 : index
    %c0_16 = arith.constant 0 : index
    %20 = vector.load %arg7[%c0_15, %c0_16] : memref<1x16xf32, #tpu.memory_space<vmem>>, vector<1x16xf32>
    %21 = vector.broadcast %20 : vector<1x16xf32> to vector<8x16xf32>
    %22 = arith.addf %19, %21 : vector<8x16xf32>
    %cst_17 = arith.constant 0.000000e+00 : f32
    %23 = vector.broadcast %cst_17 : f32 to vector<8x16xf32>
    %24 = arith.maximumf %22, %23 : vector<8x16xf32>
    %cst_18 = arith.constant dense<0xFF800000> : vector<8xf32>
    %25 = vector.multi_reduction <maximumf>, %24, %cst_18 [1] : vector<8x16xf32> to vector<8xf32>
    %26 = vector.shape_cast %25 : vector<8xf32> to vector<8x1xf32>
    %27 = vector.broadcast %26 : vector<8x1xf32> to vector<8x16xf32>
    %28 = arith.subf %24, %27 : vector<8x16xf32>
    %29 = math.exp %28 : vector<8x16xf32>
    %cst_19 = arith.constant dense<0.000000e+00> : vector<8xf32>
    %30 = vector.multi_reduction <add>, %29, %cst_19 [1] : vector<8x16xf32> to vector<8xf32>
    %31 = vector.shape_cast %30 : vector<8xf32> to vector<8x1xf32>
    %32 = math.log %31 : vector<8x1xf32>
    %33 = vector.broadcast %32 : vector<8x1xf32> to vector<8x16xf32>
    %34 = arith.subf %28, %33 : vector<8x16xf32>
    %c0_20 = arith.constant 0 : index
    %c0_21 = arith.constant 0 : index
    %35 = vector.load %arg8[%c0_20, %c0_21] : memref<8x16xf32, #tpu.memory_space<vmem>>, vector<8x16xf32>
    tpu.vector_store %arg8[%c0_20, %c0_21], %34 {strides = array<i32>} : memref<8x16xf32, #tpu.memory_space<vmem>>, vector<8x16xf32>,
    return
  }
  func.func @transform_0(%arg0: i32) -> (i32, i32) {
    %c0_i32 = arith.constant 0 : i32
    %c0_i32_0 = arith.constant 0 : i32
    return %arg0, %c0_i32 : i32, i32
  }
  func.func @transform_1(%arg0: i32) -> (i32, i32) {
    %c0_i32 = arith.constant 0 : i32
    %c0_i32_0 = arith.constant 0 : i32
    %c0_i32_1 = arith.constant 0 : i32
    return %c0_i32, %c0_i32_0 : i32, i32
  }
  func.func @transform_2(%arg0: i32) -> (i32, i32) {
    %c0_i32 = arith.constant 0 : i32
    %c0_i32_0 = arith.constant 0 : i32
    %c0_i32_1 = arith.constant 0 : i32
    return %c0_i32, %c0_i32_0 : i32, i32
  }
  func.func @transform_3(%arg0: i32) -> (i32, i32) {
    %c0_i32 = arith.constant 0 : i32
    %c0_i32_0 = arith.constant 0 : i32
    %c0_i32_1 = arith.constant 0 : i32
    return %c0_i32, %c0_i32_0 : i32, i32
  }
  func.func @transform_4(%arg0: i32) -> (i32, i32) {
    %c0_i32 = arith.constant 0 : i32
    %c0_i32_0 = arith.constant 0 : i32
    %c0_i32_1 = arith.constant 0 : i32
    return %c0_i32, %c0_i32_0 : i32, i32
  }
  func.func @transform_5(%arg0: i32) -> (i32, i32) {
    %c0_i32 = arith.constant 0 : i32
    %c0_i32_0 = arith.constant 0 : i32
    %c0_i32_1 = arith.constant 0 : i32
    return %c0_i32, %c0_i32_0 : i32, i32
  }
  func.func @transform_6(%arg0: i32) -> (i32, i32) {
    %c0_i32 = arith.constant 0 : i32
    %c0_i32_0 = arith.constant 0 : i32
    %c0_i32_1 = arith.constant 0 : i32
    return %c0_i32, %c0_i32_0 : i32, i32
  }
  func.func @transform_7(%arg0: i32) -> (i32, i32) {
    %c0_i32 = arith.constant 0 : i32
    %c0_i32_0 = arith.constant 0 : i32
    return %arg0, %c0_i32 : i32, i32
  }
}

</mosaic_0001>

<bundles_post_ra>
// kernel: tpu_custom_call.1
= control target key start
LH: loop header
LB: loop body
LE: loop exit
PB: predicated region body
PF: predicated region fallthrough
CT: control target
= control target key end

     0   :  { %12 = vsyncpa [#allocation3], 0  ;;  %s429_s0 = inlined_call_operand.vmem [shape: f32[8,32], index: 0, kind: input, shape index: {}]   ;;  %s430_s1 = inlined_call_operand.hbm [shape: bf16[32,64], index: 1, kind: input, shape index: {}]   ;;  %s431_s2 = inlined_call_operand.vmem [shape: f32[1,64], index: 2, kind: input, shape index: {}]   ;;  %s432_s3 = inlined_call_operand.vmem [shape: bf16[64,64], index: 3, kind: input, shape index: {}]   ;;  %s433_s4 = inlined_call_operand.vmem [shape: f32[1,64], index: 4, kind: input, shape index: {}]   ;;  %s434_s5 = inlined_call_operand.vmem [shape: bf16[64,16], index: 5, kind: input, shape index: {}]   ;;  %s435_s6 = inlined_call_operand.vmem [shape: f32[1,16], index: 6, kind: input, shape index: {}]   ;;  %s436_s7 = inlined_call_operand.hbm [shape: f32[8,16], index: 7, kind: output, shape index: {}]  }
   0x1   :  { %13 = vsyncpa [#allocation4], 0  ;;  %s20_s26 = sshll.u32 %s430_s1, 4  ;;  %s340_s27 = smov [#allocation2]   ;;  %s21_s26 = int_to_ptr.hbm [resolvable:$true] %s20_s26 }
   0x2   :  { %s22_s28 = sshll.u32 %s340_s27, 4  ;;  %s341_s29 = smov 64   ;;  %s23_s28 = int_to_ptr.vmem [resolvable:$true] %s22_s28 }
   0x3   :  { %s342_s30 = smov 4  }
   0x4   :  { %28 = dma.hbm_to_vmem [thread:$0]  %s21_s26, 256, %s23_s28, [#allocation3], %s341_s29, %s341_s29, %s342_s30  }
   0x5   :  { %336 = dma.done.wait [#allocation3], 256  }
   0x6   :  { %337 = vsyncadd [#allocation3], 4294967040  ;;  %v268_v0 = vld [vmem:[#allocation2 + $0x8] sm:$0xff]  ;;  %v267_v1 = vld [vmem:[#allocation2] sm:$0xff]  ;;  %vm66_vm0 = vcmask 261120   ;;  %vm121_vm1 = vcmask 523264  }
   0x7   :  { %v272_v2 = vld [vmem:[%s432_s3 + $0x18] sm:$0xff]  ;;  %76 = vmatpush.bf16.msra.mxu0 %v268_v0  ;;  %v44_v3 = vld [vmem:[%s429_s0] sm:$0xff]  ;;  %v271_v4 = vld [vmem:[%s432_s3 + $0x10] sm:$0xff]  ;;  %vm193_vm2 = vcmask 130048   ;;  %s214_s29 = sshll.u32 %s436_s7, 4  ;;  %s215_s29 = int_to_ptr.hbm [resolvable:$true] %s214_s29 }
   0x8   :  { %129 = vmatpush.bf16.msra.mxu1 %v272_v2  ;;  %v45_v5 = vpack.c.bf16 %v44_v3, %v44_v3  ;;  %v270_v6 = vld [vmem:[%s432_s3 + $0x8] sm:$0xff]  ;;  %v269_v7 = vld [vmem:[%s432_s3] sm:$0xff]  ;;  %v276_v8 = vld [vmem:[%s434_s5 + $0x18] sm:$0xff] }
   0x9   :  { %183 = vmatpush.bf16.msra.mxu2 %v276_v8  ;;  %v275_v9 = vld [vmem:[%s434_s5 + $0x10] sm:$0xff]  ;;  %v281_v10 = vld [vmem:[%s431_s2] ss:$0 sm:$0xff]  ;;  %v274_v16 = vld [vmem:[%s434_s5 + $0x8] sm:$0xff] }
   0xa   :  { %v273_v17 = vld [vmem:[%s434_s5] sm:$0xff] }
   0xb   :  { %77 = vmatpush.bf16.msra.mxu0 %v267_v1  ;;  %v282_v18 = vld [vmem:[%s433_s4] ss:$0 sm:$0xff]  ;;  %s343_s4 = smov [#allocation5]  }
   0xc   :  { %130 = vmatpush.bf16.msra.mxu1 %v271_v4  ;;  %v283_v24 = vld [vmem:[%s435_s6] ss:$0 sm:$0xff]  ;;  %s212_s5 = sshll.u32 %s343_s4, 4  ;;  %s213_s5 = int_to_ptr.vmem [resolvable:$true] %s212_s5 }
   0xd   :  { %184 = vmatpush.bf16.msra.mxu2 %v275_v9 }
   0xe   :  { %232 = vmatmul.msk.bf16.vlgmr.msra.gmra.mxu0 %vm66_vm0, %v45_v5 }
  0x10   :  { %131 = vmatpush.bf16.msra.mxu1 %v270_v6 }
  0x11   :  { %185 = vmatpush.bf16.msra.mxu2 %v274_v16 }
  0x14   :  { %132 = vmatpush.bf16.msra.mxu1 %v269_v7 }
  0x15   :  { %186 = vmatpush.bf16.msra.mxu2 %v273_v17 }
  0x8b   :  { %v79_v11 = vpop.f32.mrf.mxu0 }
  0x8c   :  { %v80_v12 = vadd.f32 %v281_v10, %v79_v11 }
  0x8e   :  { %v83_v13 = vmax.f32 %v80_v12, 0.0 }
  0x90   :  { %v84_v14 = vpack.c.bf16 %v83_v13, %v83_v13 }
  0x92   :  { %249 = vmatmul.msk.bf16.vlgmr.msra.gmra.mxu1 %vm121_vm1, %v84_v14 }
  0x93   :  { %v81_v15 = vpop.f32.mrf.mxu0 }
 0x10f   :  { %v134_v19 = vpop.f32.mrf.mxu1 }
 0x110   :  { %v135_v20 = vadd.f32 %v282_v18, %v134_v19 }
 0x112   :  { %v138_v21 = vmax.f32 %v135_v20, 0.0 }
 0x114   :  { %v139_v22 = vpack.c.bf16 %v138_v21, %v138_v21 }
 0x116   :  { %266 = vmatmul.msk.bf16.vlgmr.msra.gmra.mxu2 %vm121_vm1, %v139_v22 }
 0x117   :  { %v136_v23 = vpop.f32.mrf.mxu1 }
 0x199   :  { %v188_v25 = vpop.f32.mrf.mxu2 }
 0x19a   :  { %v189_v26 = vadd.f32 %v283_v24, %v188_v25 }
 0x19c   :  { %v192_v27 = vmax.f32 %v189_v26, 0.0 }
 0x19e   :  { %v194_v28 = vsel %vm193_vm2, %v192_v27, -inf }
 0x19f   :  { %195 = vmax.xlane.f32.xlu0 %v194_v28 }
 0x1a1   :  { %v190_v29 = vpop.f32.mrf.mxu2 }
 0x212   :  { %v196_v30 = vpop.xlane.xlu0 %195 }
 0x213   :  { %v197_v31 = vsub.f32 %v192_v27, %v196_v30 }
 0x215   :  { %v198_v32 = vmul.f32 1.442695, %v197_v31 }
 0x217   :  { %284 = vpow2.f32 %v198_v32 }
 0x21d   :  { %v285_v33 = vpop.eup %284 }
 0x21e   :  { %v200_v34 = vsel %vm193_vm2, %v285_v33, 0.0 }
 0x21f   :  { %201 = vadd.xlane.f32.xlu0 %v200_v34 }
 0x292   :  { %v202_v35 = vpop.xlane.xlu0 %201 }
 0x293   :  { %286 = vlog2.f32 %v202_v35 }
 0x299   :  { %v287_v36 = vpop.eup %286 }
 0x29a   :  { %v204_v37 = vmul.f32 0.6931472, %v287_v36 }
 0x29c   :  { %v205_v38 = vsub.f32 %v197_v31, %v204_v37 }
 0x29e   :  { %206 = vst.msk [vmem:[#allocation5] sm:$0xff] %vm193_vm2, %v205_v38 }
 0x29f   :  { %217 = dma.vmem_to_hbm [thread:$0]  %s213_s5, 128, %s215_s29, [#allocation4]  }
 0x2a0   :  { %338 = dma.done.wait [#allocation4], 128  }
 0x2a1   :  { %339 = vsyncadd [#allocation4], 4294967168 }
 0x2a2   :  { %222 = vsyncpa [#allocation3], 1 }
 0x2a3   :  { %223 = vsyncpa [#allocation4], 1 }

</bundles_post_ra>
